<compile_context>
chip_gen: v5e
topology: v5e:2x2
jax: 0.10.0
libtpu: 0.0.40
codegen_flags: <defaults>
</compile_context>

<pallas_src>
import math

import jax
import jax.numpy as jnp
from jax.experimental import pallas as pl
from jax.experimental.pallas import tpu as pltpu


# ----------------------------------------------------------------------------
# helpers
# ----------------------------------------------------------------------------
_MXU_DTYPE = jnp.bfloat16  # MXU-native operand dtype on v5e/v6e/v7x


def _mm(a, b):
    """MXU matmul: bf16 operands, f32 accumulation."""
    return jnp.dot(a.astype(_MXU_DTYPE), b.astype(_MXU_DTYPE),
                   preferred_element_type=jnp.float32)


def _full_spec(shape):
    return pl.BlockSpec(shape, lambda *_: (0,) * len(shape))


# ----------------------------------------------------------------------------
# single fused kernel: decoupling -> frequency -> residual/temporal/heads
# (one grid step per batch element, last timestep only)
# ----------------------------------------------------------------------------
def _fused_kernel(inp_ref, af_ref, at_ref, nconst_ref,
                  win_ref, wg_ref, bg_ref,
                  wf_ref, bf_ref, wtg_ref, btg_ref,
                  wdh_ref, bdh_ref, gam_ref, bet_ref,
                  wt12_ref, bt12_ref, wil_ref, bil_ref, o_ref):
    H = nconst_ref.shape[-1]
    Te2 = wtg_ref.shape[0]
    inp = inp_ref[...]                                    # [N, 2Te+C]  bf16

    # --- DecouplingBlock: h = [x||eu||ed||tim||tiy] @ W_dec + b  (embedding
    #     contribution folded into nconst outside); dif = h * sigmoid(gate)
    h = _mm(inp, win_ref[...]) + nconst_ref[...]          # [N, H] f32 (= x_h[:,-1])
    g = _mm(h, wg_ref[...]) + bg_ref[...]
    dif_o = h * jax.nn.sigmoid(g)                         # diffusion_signal_o[:,-1]

    # --- FrequencyBlock: adaptive-graph propagation, freq head * sigmoid(t-gate)
    prop = _mm(af_ref[...], dif_o)                        # [N, H]
    sig = _mm(prop, wf_ref[...]) + bf_ref[...]            # [N, S]
    gate = _mm(inp[:, :Te2], wtg_ref[...]) + btg_ref[...]
    dsig = sig * jax.nn.sigmoid(gate)                     # diffusion_signal[:,-1]

    # --- dif_hid (H-wide) + dif_linear (1-wide) heads fused: one [S, H+1] matmul
    hid_fc = _mm(dsig, wdh_ref[...]) + bdh_ref[...]       # [N, H+1]
    dif_hid = hid_fc[:, :H]
    dif_fc = hid_fc[:, H:]                                # [N, 1]

    # --- ResidualDecomp: LayerNorm(history - relu(dif_hid)) over hidden dim (f32)
    u = h - jnp.maximum(dif_hid, 0.0)
    mu = jnp.mean(u, axis=-1, keepdims=True)
    var = jnp.mean(jnp.square(u - mu), axis=-1, keepdims=True)
    dif_res = (u - mu) * jax.lax.rsqrt(var + 1e-5) * gam_ref[...] + bet_ref[...]

    # --- TemporalBlock (edge-graph propagation + tanh*sigmoid with the two H->H
    #     heads concatenated into one [H, 2H] matmul), inh_linear, final sum
    inherent = h - dif_o + dif_res
    prop2 = _mm(at_ref[...], inherent)
    t12 = _mm(prop2, wt12_ref[...]) + bt12_ref[...]       # [N, 2H]
    temporal = jnp.tanh(t12[:, :H]) * jax.nn.sigmoid(t12[:, H:])
    inh_fc = _mm(temporal, wil_ref[...]) + bil_ref[...]   # [N, 1]
    o_ref[...] = inh_fc + dif_fc


# ----------------------------------------------------------------------------
# forward
# ----------------------------------------------------------------------------
def iedgnn_forward(p, x, edge_index, emb_u, emb_d, tim, tiy):
    B, T, N, C = x.shape
    H = p["W_gate"].shape[0]
    S = p["W_freq"].shape[-1]
    Te2 = p["W_tgate"].shape[0]
    Cin = Te2 + C
    bf16 = _MXU_DTYPE

    # Exact algorithmic cut: only t = T-1 is ever consumed by the output.
    # Column order [tim, tiy, x] so the t-gate feature slice starts at lane 0.
    inp = jnp.concatenate([tim[:, -1], tiy[:, -1], x[:, -1]], axis=-1)  # [B,N,Cin]

    # Node-embedding contribution of the decoupling linear: invariant over (B,T),
    # computed once (tiny [N,2E]@[2E,H]) instead of broadcasting to [B,T,N,2E].
    node_const = (jnp.concatenate([emb_u, emb_d], axis=-1) @ p["W_emb"]
                  + p["b_dec"])                                         # [N, H]

    # Tiny adjacencies (computed in plain jnp; a kernel launch here would be
    # pure overhead): adaptive adjacency for the frequency block, normalized
    # edge adjacency (with self-loops) for the temporal block.
    A_f = jax.nn.softmax(jnp.maximum(emb_u @ emb_d.T, 0.0), axis=-1)
    A_t = jnp.zeros((N, N), jnp.float32).at[
        edge_index[0], edge_index[1]].add(1.0)
    A_t = A_t + jnp.eye(N, dtype=jnp.float32)
    A_t = A_t / jnp.sum(A_t, axis=-1, keepdims=True)

    out_last = pl.pallas_call(
        _fused_kernel,
        out_shape=jax.ShapeDtypeStruct((B, N, 1), jnp.float32),
        grid=(B,),
        in_specs=[pl.BlockSpec((None, N, Cin), lambda b: (b, 0, 0)),
                  _full_spec((N, N)), _full_spec((N, N)),
                  _full_spec((N, H)),
                  _full_spec((Cin, H)),
                  _full_spec((H, H)), _full_spec((1, H)),
                  _full_spec((H, S)), _full_spec((1, S)),
                  _full_spec((Te2, S)), _full_spec((1, S)),
                  _full_spec((S, H + 1)), _full_spec((1, H + 1)),
                  _full_spec((1, H)), _full_spec((1, H)),
                  _full_spec((H, 2 * H)), _full_spec((1, 2 * H)),
                  _full_spec((H, 1)), _full_spec((1, 1))],
        out_specs=pl.BlockSpec((None, N, 1), lambda b: (b, 0, 0)),
        compiler_params=pltpu.CompilerParams(
            dimension_semantics=("parallel",)),
    )(inp.astype(bf16), A_f.astype(bf16), A_t.astype(bf16), node_const,
      p["W_in"].astype(bf16),
      p["W_gate"].astype(bf16), p["b_gate"].reshape(1, H),
      p["W_freq"].astype(bf16), p["b_freq"].reshape(1, S),
      p["W_tgate"].astype(bf16), p["b_tgate"].reshape(1, S),
      p["W_dh_dl"].astype(bf16), p["b_dh_dl"],
      p["ln_gamma"].reshape(1, H), p["ln_beta"].reshape(1, H),
      p["W_t12"].astype(bf16), p["b_t12"],
      p["W_il"].astype(bf16), p["b_il"].reshape(1, 1))

    return out_last[:, None]                              # [B, 1, N, 1]


# ----------------------------------------------------------------------------
# deterministic parameter init (heads pre-concatenated / W_dec pre-split once)
# ----------------------------------------------------------------------------
def init_params(key, C, E, Te, H):
    def lin(k, fi, fo):
        k1, k2 = jax.random.split(k)
        s = 1.0 / math.sqrt(fi)
        return (jax.random.uniform(k1, (fi, fo), jnp.float32, -s, s),
                jax.random.uniform(k2, (fo,), jnp.float32, -s, s))

    keys = jax.random.split(key, 9)
    Din = C + 2 * E + 2 * Te
    W_dec, b_dec = lin(keys[0], Din, H)
    W_gate, b_gate = lin(keys[1], H, H)
    W_freq, b_freq = lin(keys[2], H, 11)
    W_tgate, b_tgate = lin(keys[3], 2 * Te, 11)
    W_t1, b_t1 = lin(keys[4], H, H)
    W_t2, b_t2 = lin(keys[5], H, H)
    W_dl, b_dl = lin(keys[6], 11, 1)
    W_dh, b_dh = lin(keys[7], 11, H)
    W_il, b_il = lin(keys[8], H, 1)

    # Split W_dec rows ([x, emb_u, emb_d, tim, tiy] order) and reorder the
    # per-(b,t) part to [tim, tiy, x]; the embedding rows are applied once
    # outside the kernel (their input is (B,T)-invariant).
    W_x = W_dec[:C]
    W_emb = W_dec[C:C + 2 * E]
    W_tm = W_dec[C + 2 * E:C + 2 * E + Te]
    W_ty = W_dec[C + 2 * E + Te:]

    p = {}
    p["W_in"] = jnp.concatenate([W_tm, W_ty, W_x], axis=0)       # [2Te+C, H]
    p["W_emb"] = W_emb                                           # [2E, H]
    p["b_dec"] = b_dec
    p["W_gate"], p["b_gate"] = W_gate, b_gate
    p["W_freq"], p["b_freq"] = W_freq, b_freq
    p["W_tgate"], p["b_tgate"] = W_tgate, b_tgate
    p["W_dh_dl"] = jnp.concatenate([W_dh, W_dl], axis=-1)        # [11, H+1]
    p["b_dh_dl"] = jnp.concatenate([b_dh, b_dl]).reshape(1, H + 1)
    p["W_t12"] = jnp.concatenate([W_t1, W_t2], axis=-1)          # [H, 2H]
    p["b_t12"] = jnp.concatenate([b_t1, b_t2]).reshape(1, 2 * H)
    p["W_il"], p["b_il"] = W_il, b_il
    p["ln_gamma"] = jnp.ones((H,), jnp.float32)
    p["ln_beta"] = jnp.zeros((H,), jnp.float32)
    return p


# ----------------------------------------------------------------------------
if __name__ == "__main__":
    B, T, N = 2, 8, 16          # batch, seq_length, nodes
    C, E, Te, H = 3, 16, 4, 32  # node_features, node_emb, time_emb, hidden

    key = jax.random.PRNGKey(0)
    keys = jax.random.split(key, 6)
    x = jax.random.normal(keys[0], (B, T, N, C), jnp.float32)
    emb_u = jax.random.normal(keys[1], (N, E), jnp.float32) * 0.1
    emb_d = jax.random.normal(keys[2], (N, E), jnp.float32) * 0.1
    tim = jax.random.normal(keys[3], (B, T, N, Te), jnp.float32)
    tiy = jax.random.normal(keys[4], (B, T, N, Te), jnp.float32)

    src = jnp.arange(N, dtype=jnp.int32)
    dst = (src + 1) % N
    edge_index = jnp.stack(
        [jnp.concatenate([src, dst]), jnp.concatenate([dst, src])], axis=0)

    params = init_params(keys[5], C, E, Te, H)

    fwd = jax.jit(iedgnn_forward)
    out = jax.block_until_ready(
        fwd(params, x, edge_index, emb_u, emb_d, tim, tiy))
    assert out.shape == (B, 1, N, 1), out.shape
    assert bool(jnp.all(jnp.isfinite(out)))
    print("KERNEL_OK")
</pallas_src>

<mosaic_0001>
module attributes {stable_mosaic.version = 11 : i64} {
  func.func @_fused_kernel(%arg0: i32, %arg1: memref<1x16x11xbf16, #tpu.memory_space<vmem>>, %arg2: memref<16x16xbf16, #tpu.memory_space<vmem>>, %arg3: memref<16x16xbf16, #tpu.memory_space<vmem>>, %arg4: memref<16x32xf32, #tpu.memory_space<vmem>>, %arg5: memref<11x32xbf16, #tpu.memory_space<vmem>>, %arg6: memref<32x32xbf16, #tpu.memory_space<vmem>>, %arg7: memref<1x32xf32, #tpu.memory_space<vmem>>, %arg8: memref<32x11xbf16, #tpu.memory_space<vmem>>, %arg9: memref<1x11xf32, #tpu.memory_space<vmem>>, %arg10: memref<8x11xbf16, #tpu.memory_space<vmem>>, %arg11: memref<1x11xf32, #tpu.memory_space<vmem>>, %arg12: memref<11x33xbf16, #tpu.memory_space<vmem>>, %arg13: memref<1x33xf32, #tpu.memory_space<vmem>>, %arg14: memref<1x32xf32, #tpu.memory_space<vmem>>, %arg15: memref<1x32xf32, #tpu.memory_space<vmem>>, %arg16: memref<32x64xbf16, #tpu.memory_space<vmem>>, %arg17: memref<1x64xf32, #tpu.memory_space<vmem>>, %arg18: memref<32x1xbf16, #tpu.memory_space<vmem>>, %arg19: memref<1x1xf32, #tpu.memory_space<vmem>>, %arg20: memref<1x16x1xf32, #tpu.memory_space<vmem>>) attributes {dimension_semantics = [#tpu.dimension_semantics<parallel>], iteration_bounds = array<i64: 2>, scalar_prefetch = 0 : i64, scratch_operands = 0 : i64, tpu.core_type = #tpu.core_type<tc>, window_params = [{transform_indices = @transform_0, window_bounds = array<i64: 1, 16, 11>}, {pipeline_mode = #tpu.pipeline_mode<synchronous>, transform_indices = @transform_1, window_bounds = array<i64: 16, 16>}, {pipeline_mode = #tpu.pipeline_mode<synchronous>, transform_indices = @transform_2, window_bounds = array<i64: 16, 16>}, {pipeline_mode = #tpu.pipeline_mode<synchronous>, transform_indices = @transform_3, window_bounds = array<i64: 16, 32>}, {pipeline_mode = #tpu.pipeline_mode<synchronous>, transform_indices = @transform_4, window_bounds = array<i64: 11, 32>}, {pipeline_mode = #tpu.pipeline_mode<synchronous>, transform_indices = @transform_5, window_bounds = array<i64: 32, 32>}, {pipeline_mode = #tpu.pipeline_mode<synchronous>, transform_indices = @transform_6, window_bounds = array<i64: 1, 32>}, {pipeline_mode = #tpu.pipeline_mode<synchronous>, transform_indices = @transform_7, window_bounds = array<i64: 32, 11>}, {pipeline_mode = #tpu.pipeline_mode<synchronous>, transform_indices = @transform_8, window_bounds = array<i64: 1, 11>}, {pipeline_mode = #tpu.pipeline_mode<synchronous>, transform_indices = @transform_9, window_bounds = array<i64: 8, 11>}, {pipeline_mode = #tpu.pipeline_mode<synchronous>, transform_indices = @transform_10, window_bounds = array<i64: 1, 11>}, {pipeline_mode = #tpu.pipeline_mode<synchronous>, transform_indices = @transform_11, window_bounds = array<i64: 11, 33>}, {pipeline_mode = #tpu.pipeline_mode<synchronous>, transform_indices = @transform_12, window_bounds = array<i64: 1, 33>}, {pipeline_mode = #tpu.pipeline_mode<synchronous>, transform_indices = @transform_13, window_bounds = array<i64: 1, 32>}, {pipeline_mode = #tpu.pipeline_mode<synchronous>, transform_indices = @transform_14, window_bounds = array<i64: 1, 32>}, {pipeline_mode = #tpu.pipeline_mode<synchronous>, transform_indices = @transform_15, window_bounds = array<i64: 32, 64>}, {pipeline_mode = #tpu.pipeline_mode<synchronous>, transform_indices = @transform_16, window_bounds = array<i64: 1, 64>}, {pipeline_mode = #tpu.pipeline_mode<synchronous>, transform_indices = @transform_17, window_bounds = array<i64: 32, 1>}, {pipeline_mode = #tpu.pipeline_mode<synchronous>, transform_indices = @transform_18, window_bounds = array<i64: 1, 1>}, {transform_indices = @transform_19, window_bounds = array<i64: 1, 16, 1>}]} {
    %c0 = arith.constant 0 : index
    %c0_0 = arith.constant 0 : index
    %c0_1 = arith.constant 0 : index
    %0 = vector.load %arg1[%c0, %c0_0, %c0_1] : memref<1x16x11xbf16, #tpu.memory_space<vmem>>, vector<1x16x11xbf16>
    %1 = vector.shape_cast %0 : vector<1x16x11xbf16> to vector<16x11xbf16>
    %c0_2 = arith.constant 0 : index
    %c0_3 = arith.constant 0 : index
    %2 = vector.load %arg5[%c0_2, %c0_3] : memref<11x32xbf16, #tpu.memory_space<vmem>>, vector<11x32xbf16>
    %cst = arith.constant dense<0.000000e+00> : vector<16x32xf32>
    %3 = tpu.matmul %1, %2, %cst {dimension_numbers = #tpu.dot_dimension_numbers<[1], [0], [0], [1], [0, 0, 1, 1], [], []>} : vector<16x11xbf16>, vector<11x32xbf16>, vector<16x32xf32> -> vector<16x32xf32>
    %c0_4 = arith.constant 0 : index
    %c0_5 = arith.constant 0 : index
    %4 = vector.load %arg4[%c0_4, %c0_5] : memref<16x32xf32, #tpu.memory_space<vmem>>, vector<16x32xf32>
    %5 = arith.addf %3, %4 : vector<16x32xf32>
    %c0_6 = arith.constant 0 : index
    %c0_7 = arith.constant 0 : index
    %6 = vector.load %arg6[%c0_6, %c0_7] : memref<32x32xbf16, #tpu.memory_space<vmem>>, vector<32x32xbf16>
    %7 = arith.truncf %5 : vector<16x32xf32> to vector<16x32xbf16>
    %cst_8 = arith.constant dense<0.000000e+00> : vector<16x32xf32>
    %8 = tpu.matmul %7, %6, %cst_8 {dimension_numbers = #tpu.dot_dimension_numbers<[1], [0], [0], [1], [0, 0, 1, 1], [], []>} : vector<16x32xbf16>, vector<32x32xbf16>, vector<16x32xf32> -> vector<16x32xf32>
    %c0_9 = arith.constant 0 : index
    %c0_10 = arith.constant 0 : index
    %9 = vector.load %arg7[%c0_9, %c0_10] : memref<1x32xf32, #tpu.memory_space<vmem>>, vector<1x32xf32>
    %10 = vector.broadcast %9 : vector<1x32xf32> to vector<16x32xf32>
    %11 = arith.addf %8, %10 : vector<16x32xf32>
    %12 = arith.negf %11 : vector<16x32xf32>
    %13 = math.exp %12 : vector<16x32xf32>
    %cst_11 = arith.constant 1.000000e+00 : f32
    %14 = vector.broadcast %cst_11 : f32 to vector<16x32xf32>
    %15 = arith.addf %14, %13 : vector<16x32xf32>
    %16 = arith.divf %14, %15 : vector<16x32xf32>
    %17 = arith.mulf %5, %16 : vector<16x32xf32>
    %c0_12 = arith.constant 0 : index
    %c0_13 = arith.constant 0 : index
    %18 = vector.load %arg2[%c0_12, %c0_13] : memref<16x16xbf16, #tpu.memory_space<vmem>>, vector<16x16xbf16>
    %19 = arith.truncf %17 : vector<16x32xf32> to vector<16x32xbf16>
    %cst_14 = arith.constant dense<0.000000e+00> : vector<16x32xf32>
    %20 = tpu.matmul %18, %19, %cst_14 {dimension_numbers = #tpu.dot_dimension_numbers<[1], [0], [0], [1], [0, 0, 1, 1], [], []>} : vector<16x16xbf16>, vector<16x32xbf16>, vector<16x32xf32> -> vector<16x32xf32>
    %c0_15 = arith.constant 0 : index
    %c0_16 = arith.constant 0 : index
    %21 = vector.load %arg8[%c0_15, %c0_16] : memref<32x11xbf16, #tpu.memory_space<vmem>>, vector<32x11xbf16>
    %22 = arith.truncf %20 : vector<16x32xf32> to vector<16x32xbf16>
    %cst_17 = arith.constant dense<0.000000e+00> : vector<16x11xf32>
    %23 = tpu.matmul %22, %21, %cst_17 {dimension_numbers = #tpu.dot_dimension_numbers<[1], [0], [0], [1], [0, 0, 1, 1], [], []>} : vector<16x32xbf16>, vector<32x11xbf16>, vector<16x11xf32> -> vector<16x11xf32>
    %c0_18 = arith.constant 0 : index
    %c0_19 = arith.constant 0 : index
    %24 = vector.load %arg9[%c0_18, %c0_19] : memref<1x11xf32, #tpu.memory_space<vmem>>, vector<1x11xf32>
    %25 = vector.broadcast %24 : vector<1x11xf32> to vector<16x11xf32>
    %26 = arith.addf %23, %25 : vector<16x11xf32>
    %27 = vector.extract_strided_slice %1 {offsets = [0, 0], sizes = [16, 8], strides = [1, 1]} : vector<16x11xbf16> to vector<16x8xbf16>
    %c0_20 = arith.constant 0 : index
    %c0_21 = arith.constant 0 : index
    %28 = vector.load %arg10[%c0_20, %c0_21] : memref<8x11xbf16, #tpu.memory_space<vmem>>, vector<8x11xbf16>
    %cst_22 = arith.constant dense<0.000000e+00> : vector<16x11xf32>
    %29 = tpu.matmul %27, %28, %cst_22 {dimension_numbers = #tpu.dot_dimension_numbers<[1], [0], [0], [1], [0, 0, 1, 1], [], []>} : vector<16x8xbf16>, vector<8x11xbf16>, vector<16x11xf32> -> vector<16x11xf32>
    %c0_23 = arith.constant 0 : index
    %c0_24 = arith.constant 0 : index
    %30 = vector.load %arg11[%c0_23, %c0_24] : memref<1x11xf32, #tpu.memory_space<vmem>>, vector<1x11xf32>
    %31 = vector.broadcast %30 : vector<1x11xf32> to vector<16x11xf32>
    %32 = arith.addf %29, %31 : vector<16x11xf32>
    %33 = arith.negf %32 : vector<16x11xf32>
    %34 = math.exp %33 : vector<16x11xf32>
    %cst_25 = arith.constant 1.000000e+00 : f32
    %35 = vector.broadcast %cst_25 : f32 to vector<16x11xf32>
    %36 = arith.addf %35, %34 : vector<16x11xf32>
    %37 = arith.divf %35, %36 : vector<16x11xf32>
    %38 = arith.mulf %26, %37 : vector<16x11xf32>
    %c0_26 = arith.constant 0 : index
    %c0_27 = arith.constant 0 : index
    %39 = vector.load %arg12[%c0_26, %c0_27] : memref<11x33xbf16, #tpu.memory_space<vmem>>, vector<11x33xbf16>
    %40 = arith.truncf %38 : vector<16x11xf32> to vector<16x11xbf16>
    %cst_28 = arith.constant dense<0.000000e+00> : vector<16x33xf32>
    %41 = tpu.matmul %40, %39, %cst_28 {dimension_numbers = #tpu.dot_dimension_numbers<[1], [0], [0], [1], [0, 0, 1, 1], [], []>} : vector<16x11xbf16>, vector<11x33xbf16>, vector<16x33xf32> -> vector<16x33xf32>
    %c0_29 = arith.constant 0 : index
    %c0_30 = arith.constant 0 : index
    %42 = vector.load %arg13[%c0_29, %c0_30] : memref<1x33xf32, #tpu.memory_space<vmem>>, vector<1x33xf32>
    %43 = vector.broadcast %42 : vector<1x33xf32> to vector<16x33xf32>
    %44 = arith.addf %41, %43 : vector<16x33xf32>
    %45 = vector.extract_strided_slice %44 {offsets = [0, 0], sizes = [16, 32], strides = [1, 1]} : vector<16x33xf32> to vector<16x32xf32>
    %46 = vector.extract_strided_slice %44 {offsets = [0, 32], sizes = [16, 1], strides = [1, 1]} : vector<16x33xf32> to vector<16x1xf32>
    %cst_31 = arith.constant 0.000000e+00 : f32
    %47 = vector.broadcast %cst_31 : f32 to vector<16x32xf32>
    %48 = arith.maximumf %45, %47 : vector<16x32xf32>
    %49 = arith.subf %5, %48 : vector<16x32xf32>
    %cst_32 = arith.constant dense<0.000000e+00> : vector<16xf32>
    %50 = vector.multi_reduction <add>, %49, %cst_32 [1] : vector<16x32xf32> to vector<16xf32>
    %51 = vector.shape_cast %50 : vector<16xf32> to vector<16x1xf32>
    %cst_33 = arith.constant 3.200000e+01 : f32
    %52 = vector.broadcast %cst_33 : f32 to vector<16x1xf32>
    %53 = arith.divf %51, %52 : vector<16x1xf32>
    %54 = vector.broadcast %53 : vector<16x1xf32> to vector<16x32xf32>
    %55 = arith.subf %49, %54 : vector<16x32xf32>
    %56 = arith.mulf %55, %55 : vector<16x32xf32>
    %cst_34 = arith.constant dense<0.000000e+00> : vector<16xf32>
    %57 = vector.multi_reduction <add>, %56, %cst_34 [1] : vector<16x32xf32> to vector<16xf32>
    %58 = vector.shape_cast %57 : vector<16xf32> to vector<16x1xf32>
    %cst_35 = arith.constant 3.200000e+01 : f32
    %59 = vector.broadcast %cst_35 : f32 to vector<16x1xf32>
    %60 = arith.divf %58, %59 : vector<16x1xf32>
    %61 = vector.broadcast %53 : vector<16x1xf32> to vector<16x32xf32>
    %62 = arith.subf %49, %61 : vector<16x32xf32>
    %cst_36 = arith.constant 9.99999974E-6 : f32
    %63 = vector.broadcast %cst_36 : f32 to vector<16x1xf32>
    %64 = arith.addf %60, %63 : vector<16x1xf32>
    %65 = math.rsqrt %64 : vector<16x1xf32>
    %66 = vector.broadcast %65 : vector<16x1xf32> to vector<16x32xf32>
    %67 = arith.mulf %62, %66 : vector<16x32xf32>
    %c0_37 = arith.constant 0 : index
    %c0_38 = arith.constant 0 : index
    %68 = vector.load %arg14[%c0_37, %c0_38] : memref<1x32xf32, #tpu.memory_space<vmem>>, vector<1x32xf32>
    %69 = vector.broadcast %68 : vector<1x32xf32> to vector<16x32xf32>
    %70 = arith.mulf %67, %69 : vector<16x32xf32>
    %c0_39 = arith.constant 0 : index
    %c0_40 = arith.constant 0 : index
    %71 = vector.load %arg15[%c0_39, %c0_40] : memref<1x32xf32, #tpu.memory_space<vmem>>, vector<1x32xf32>
    %72 = vector.broadcast %71 : vector<1x32xf32> to vector<16x32xf32>
    %73 = arith.addf %70, %72 : vector<16x32xf32>
    %74 = arith.subf %5, %17 : vector<16x32xf32>
    %75 = arith.addf %74, %73 : vector<16x32xf32>
    %c0_41 = arith.constant 0 : index
    %c0_42 = arith.constant 0 : index
    %76 = vector.load %arg3[%c0_41, %c0_42] : memref<16x16xbf16, #tpu.memory_space<vmem>>, vector<16x16xbf16>
    %77 = arith.truncf %75 : vector<16x32xf32> to vector<16x32xbf16>
    %cst_43 = arith.constant dense<0.000000e+00> : vector<16x32xf32>
    %78 = tpu.matmul %76, %77, %cst_43 {dimension_numbers = #tpu.dot_dimension_numbers<[1], [0], [0], [1], [0, 0, 1, 1], [], []>} : vector<16x16xbf16>, vector<16x32xbf16>, vector<16x32xf32> -> vector<16x32xf32>
    %c0_44 = arith.constant 0 : index
    %c0_45 = arith.constant 0 : index
    %79 = vector.load %arg16[%c0_44, %c0_45] : memref<32x64xbf16, #tpu.memory_space<vmem>>, vector<32x64xbf16>
    %80 = arith.truncf %78 : vector<16x32xf32> to vector<16x32xbf16>
    %cst_46 = arith.constant dense<0.000000e+00> : vector<16x64xf32>
    %81 = tpu.matmul %80, %79, %cst_46 {dimension_numbers = #tpu.dot_dimension_numbers<[1], [0], [0], [1], [0, 0, 1, 1], [], []>} : vector<16x32xbf16>, vector<32x64xbf16>, vector<16x64xf32> -> vector<16x64xf32>
    %c0_47 = arith.constant 0 : index
    %c0_48 = arith.constant 0 : index
    %82 = vector.load %arg17[%c0_47, %c0_48] : memref<1x64xf32, #tpu.memory_space<vmem>>, vector<1x64xf32>
    %83 = vector.broadcast %82 : vector<1x64xf32> to vector<16x64xf32>
    %84 = arith.addf %81, %83 : vector<16x64xf32>
    %85 = vector.extract_strided_slice %84 {offsets = [0, 0], sizes = [16, 32], strides = [1, 1]} : vector<16x64xf32> to vector<16x32xf32>
    %86 = math.tanh %85 : vector<16x32xf32>
    %87 = vector.extract_strided_slice %84 {offsets = [0, 32], sizes = [16, 32], strides = [1, 1]} : vector<16x64xf32> to vector<16x32xf32>
    %88 = arith.negf %87 : vector<16x32xf32>
    %89 = math.exp %88 : vector<16x32xf32>
    %cst_49 = arith.constant 1.000000e+00 : f32
    %90 = vector.broadcast %cst_49 : f32 to vector<16x32xf32>
    %91 = arith.addf %90, %89 : vector<16x32xf32>
    %92 = arith.divf %90, %91 : vector<16x32xf32>
    %93 = arith.mulf %86, %92 : vector<16x32xf32>
    %c0_50 = arith.constant 0 : index
    %c0_51 = arith.constant 0 : index
    %94 = vector.load %arg18[%c0_50, %c0_51] : memref<32x1xbf16, #tpu.memory_space<vmem>>, vector<32x1xbf16>
    %95 = arith.truncf %93 : vector<16x32xf32> to vector<16x32xbf16>
    %cst_52 = arith.constant dense<0.000000e+00> : vector<16x1xf32>
    %96 = tpu.matmul %95, %94, %cst_52 {dimension_numbers = #tpu.dot_dimension_numbers<[1], [0], [0], [1], [0, 0, 1, 1], [], []>} : vector<16x32xbf16>, vector<32x1xbf16>, vector<16x1xf32> -> vector<16x1xf32>
    %c0_53 = arith.constant 0 : index
    %c0_54 = arith.constant 0 : index
    %97 = vector.load %arg19[%c0_53, %c0_54] : memref<1x1xf32, #tpu.memory_space<vmem>>, vector<1x1xf32>
    %98 = vector.broadcast %97 : vector<1x1xf32> to vector<16x1xf32>
    %99 = arith.addf %96, %98 : vector<16x1xf32>
    %100 = arith.addf %99, %46 : vector<16x1xf32>
    %c0_55 = arith.constant 0 : index
    %c0_56 = arith.constant 0 : index
    %c0_57 = arith.constant 0 : index
    %101 = vector.load %arg20[%c0_55, %c0_56, %c0_57] : memref<1x16x1xf32, #tpu.memory_space<vmem>>, vector<1x16x1xf32>
    %102 = vector.shape_cast %101 : vector<1x16x1xf32> to vector<16x1xf32>
    %103 = vector.shape_cast %100 : vector<16x1xf32> to vector<1x16x1xf32>
    tpu.vector_store %arg20[%c0_55, %c0_56, %c0_57], %103 {strides = array<i32>} : memref<1x16x1xf32, #tpu.memory_space<vmem>>, vector<1x16x1xf32>,
    return
  }
  func.func @transform_0(%arg0: i32) -> (i32, i32, i32) {
    %c0_i32 = arith.constant 0 : i32
    %c0_i32_0 = arith.constant 0 : i32
    %c0_i32_1 = arith.constant 0 : i32
    return %arg0, %c0_i32, %c0_i32_0 : i32, i32, i32
  }
  func.func @transform_1(%arg0: i32) -> (i32, i32) {
    %c0_i32 = arith.constant 0 : i32
    %c0_i32_0 = arith.constant 0 : i32
    %c0_i32_1 = arith.constant 0 : i32
    return %c0_i32, %c0_i32_0 : i32, i32
  }
  func.func @transform_2(%arg0: i32) -> (i32, i32) {
    %c0_i32 = arith.constant 0 : i32
    %c0_i32_0 = arith.constant 0 : i32
    %c0_i32_1 = arith.constant 0 : i32
    return %c0_i32, %c0_i32_0 : i32, i32
  }
  func.func @transform_3(%arg0: i32) -> (i32, i32) {
    %c0_i32 = arith.constant 0 : i32
    %c0_i32_0 = arith.constant 0 : i32
    %c0_i32_1 = arith.constant 0 : i32
    return %c0_i32, %c0_i32_0 : i32, i32
  }
  func.func @transform_4(%arg0: i32) -> (i32, i32) {
    %c0_i32 = arith.constant 0 : i32
    %c0_i32_0 = arith.constant 0 : i32
    %c0_i32_1 = arith.constant 0 : i32
    return %c0_i32, %c0_i32_0 : i32, i32
  }
  func.func @transform_5(%arg0: i32) -> (i32, i32) {
    %c0_i32 = arith.constant 0 : i32
    %c0_i32_0 = arith.constant 0 : i32
    %c0_i32_1 = arith.constant 0 : i32
    return %c0_i32, %c0_i32_0 : i32, i32
  }
  func.func @transform_6(%arg0: i32) -> (i32, i32) {
    %c0_i32 = arith.constant 0 : i32
    %c0_i32_0 = arith.constant 0 : i32
    %c0_i32_1 = arith.constant 0 : i32
    return %c0_i32, %c0_i32_0 : i32, i32
  }
  func.func @transform_7(%arg0: i32) -> (i32, i32) {
    %c0_i32 = arith.constant 0 : i32
    %c0_i32_0 = arith.constant 0 : i32
    %c0_i32_1 = arith.constant 0 : i32
    return %c0_i32, %c0_i32_0 : i32, i32
  }
  func.func @transform_8(%arg0: i32) -> (i32, i32) {
    %c0_i32 = arith.constant 0 : i32
    %c0_i32_0 = arith.constant 0 : i32
    %c0_i32_1 = arith.constant 0 : i32
    return %c0_i32, %c0_i32_0 : i32, i32
  }
  func.func @transform_9(%arg0: i32) -> (i32, i32) {
    %c0_i32 = arith.constant 0 : i32
    %c0_i32_0 = arith.constant 0 : i32
    %c0_i32_1 = arith.constant 0 : i32
    return %c0_i32, %c0_i32_0 : i32, i32
  }
  func.func @transform_10(%arg0: i32) -> (i32, i32) {
    %c0_i32 = arith.constant 0 : i32
    %c0_i32_0 = arith.constant 0 : i32
    %c0_i32_1 = arith.constant 0 : i32
    return %c0_i32, %c0_i32_0 : i32, i32
  }
  func.func @transform_11(%arg0: i32) -> (i32, i32) {
    %c0_i32 = arith.constant 0 : i32
    %c0_i32_0 = arith.constant 0 : i32
    %c0_i32_1 = arith.constant 0 : i32
    return %c0_i32, %c0_i32_0 : i32, i32
  }
  func.func @transform_12(%arg0: i32) -> (i32, i32) {
    %c0_i32 = arith.constant 0 : i32
    %c0_i32_0 = arith.constant 0 : i32
    %c0_i32_1 = arith.constant 0 : i32
    return %c0_i32, %c0_i32_0 : i32, i32
  }
  func.func @transform_13(%arg0: i32) -> (i32, i32) {
    %c0_i32 = arith.constant 0 : i32
    %c0_i32_0 = arith.constant 0 : i32
    %c0_i32_1 = arith.constant 0 : i32
    return %c0_i32, %c0_i32_0 : i32, i32
  }
  func.func @transform_14(%arg0: i32) -> (i32, i32) {
    %c0_i32 = arith.constant 0 : i32
    %c0_i32_0 = arith.constant 0 : i32
    %c0_i32_1 = arith.constant 0 : i32
    return %c0_i32, %c0_i32_0 : i32, i32
  }
  func.func @transform_15(%arg0: i32) -> (i32, i32) {
    %c0_i32 = arith.constant 0 : i32
    %c0_i32_0 = arith.constant 0 : i32
    %c0_i32_1 = arith.constant 0 : i32
    return %c0_i32, %c0_i32_0 : i32, i32
  }
  func.func @transform_16(%arg0: i32) -> (i32, i32) {
    %c0_i32 = arith.constant 0 : i32
    %c0_i32_0 = arith.constant 0 : i32
    %c0_i32_1 = arith.constant 0 : i32
    return %c0_i32, %c0_i32_0 : i32, i32
  }
  func.func @transform_17(%arg0: i32) -> (i32, i32) {
    %c0_i32 = arith.constant 0 : i32
    %c0_i32_0 = arith.constant 0 : i32
    %c0_i32_1 = arith.constant 0 : i32
    return %c0_i32, %c0_i32_0 : i32, i32
  }
  func.func @transform_18(%arg0: i32) -> (i32, i32) {
    %c0_i32 = arith.constant 0 : i32
    %c0_i32_0 = arith.constant 0 : i32
    %c0_i32_1 = arith.constant 0 : i32
    return %c0_i32, %c0_i32_0 : i32, i32
  }
  func.func @transform_19(%arg0: i32) -> (i32, i32, i32) {
    %c0_i32 = arith.constant 0 : i32
    %c0_i32_0 = arith.constant 0 : i32
    %c0_i32_1 = arith.constant 0 : i32
    return %arg0, %c0_i32, %c0_i32_0 : i32, i32, i32
  }
}

</mosaic_0001>

<bundles_post_ra>
// kernel: iedgnn_forward.1
= control target key start
LH: loop header
LB: loop body
LE: loop exit
PB: predicated region body
PF: predicated region fallthrough
CT: control target
= control target key end

     0   :  { %s1438_s20 = smov 0   ;;  %s1571_s0 = inlined_call_operand.vmem [shape: bf16[2,16,11], index: 0, kind: input, shape index: {}]   ;;  %s1572_s1 = inlined_call_operand.vmem [shape: bf16[16,16], index: 1, kind: input, shape index: {}]   ;;  %s1573_s2 = inlined_call_operand.vmem [shape: bf16[16,16], index: 2, kind: input, shape index: {}]   ;;  %s1574_s3 = inlined_call_operand.vmem [shape: f32[16,32], index: 3, kind: input, shape index: {}]   ;;  %s1575_s4 = inlined_call_operand.vmem [shape: bf16[11,32], index: 4, kind: input, shape index: {}]   ;;  %s1576_s5 = inlined_call_operand.vmem [shape: bf16[32,32], index: 5, kind: input, shape index: {}]   ;;  %s1577_s6 = inlined_call_operand.vmem [shape: f32[1,32], index: 6, kind: input, shape index: {}]   ;;  %s1578_s7 = inlined_call_operand.vmem [shape: bf16[32,11], index: 7, kind: input, shape index: {}]   ;;  %s1579_s8 = inlined_call_operand.vmem [shape: f32[1,11], index: 8, kind: input, shape index: {}]   ;;  %s1580_s9 = inlined_call_operand.vmem [shape: bf16[8,11], index: 9, kind: input, shape index: {}]   ;;  %s1581_s10 = inlined_call_operand.vmem [shape: f32[1,11], index: 10, kind: input, shape index: {}]   ;;  %s1582_s11 = inlined_call_operand.vmem [shape: bf16[11,33], index: 11, kind: input, shape index: {}]   ;;  %s1583_s12 = inlined_call_operand.vmem [shape: f32[1,33], index: 12, kind: input, shape index: {}]   ;;  %s1584_s13 = inlined_call_operand.vmem [shape: f32[1,32], index: 13, kind: input, shape index: {}]   ;;  %s1585_s14 = inlined_call_operand.vmem [shape: f32[1,32], index: 14, kind: input, shape index: {}]   ;;  %s1586_s15 = inlined_call_operand.vmem [shape: bf16[32,64], index: 15, kind: input, shape index: {}]   ;;  %s1587_s16 = inlined_call_operand.vmem [shape: f32[1,64], index: 16, kind: input, shape index: {}]   ;;  %s1588_s17 = inlined_call_operand.vmem [shape: bf16[32,1], index: 17, kind: input, shape index: {}]   ;;  %s1589_s18 = inlined_call_operand.<no memory space> [shape: f32[1,1], index: 18, kind: input, shape index: {}]   ;;  %s1590_s19 = inlined_call_operand.vmem [shape: f32[2,16,1], index: 19, kind: output, shape index: {}]  }
   0x1   :  { %1592 = sst [smem:[#allocation3_spill]] %s1571_s0  ;;  %v24_v0 = vstv %s1589_s18 }
   0x2   :  { %1593 = sst [smem:[#allocation4_spill]] %s1572_s1  ;;  %25 = vst [vmem:[#allocation2] sm:$0x1] %v24_v0 }
   0x3   :  { %1594 = sst [smem:[#allocation5_spill]] %s1573_s2 }
   0x4   :  { %1595 = sst [smem:[#allocation6_spill]] %s1574_s3 }
   0x5 LB: > { %s1178_s21 = sadd.s32 4294967295, %s1330_s20   ;;  %p1182_p0 = scmp.ge.s32.totalorder %s1330_s20, 1  ;;  %s1330_s20 = sphi %s1438_s20, %s31_s20  }
   0x6   : > { %p539_p1 = scmp.lt.s32.totalorder %s1330_s20, 3 }
   0x8   : > { %p540_p2 = pnand %p1182_p0, %p539_p1 }
   0x9   : > { %p595_p3 = scmp.lt.s32.totalorder (!%p540_p2), %s1178_s21, 1  ;;  %s1596_s3 = sld [smem:[#allocation3_spill]] (!%p540_p2) }
   0xa   : > { %543 = sbr.rel (%p540_p2) target bundleno = 1582 (0x62e), region = 96  ;;  %s1597_s22 = sld [smem:[#allocation6_spill]] (!%p540_p2) }
   0xb   : > { %s1598_s28 = sld [smem:[#allocation4_spill]] (!%p540_p2)  ;;  %s1333_s0 = smov (!%p540_p2), 96  }
   0xc   : > { %s1599_s25 = sld [smem:[#allocation5_spill]] (!%p540_p2) }
   0xf   : > { %v1193_v1 = vld [vmem:[%s1575_s4] sm:$0xf]  ;;  %v1259_v2 = vld [vmem:[%s1575_s4] sm:$0x30]  ;;  %vm626_vm0 = vcmask 1044480   ;;  %vm627_vm1 = vcmask 1045504  }
  0x10   : > { %v1194_v3 = vor.u32 %v1259_v2, %v1193_v1  ;;  %v1332_v4 = vmov 65535   ;;  %s1601_s21 = smov (!%p595_p3, %s1178_s21), 1  ;;  %vm622_vm2 = vcmask 89088   ;;  %v1261_v9 = vld [vmem:[%s1576_s5 + $0x8] sm:$0xff]  ;;  %v1260_v10 = vld [vmem:[%s1576_s5] sm:$0xff]  ;;  %vm668_vm3 = vcmask 261120  }
  0x11   : > { %v628_v5 = vsel %vm626_vm0, 4294967295, %v1332_v4  ;;  %s1256_s23 = sshll.u32 %s1601_s21, 3  ;;  %678 = vmatpush.bf16.msra.mxu1 %v1261_v9  ;;  %v610_v12 = vld [vmem:[%s1597_s22] sm:$0xff]  ;;  %v611_v13 = vld [vmem:[%s1597_s22 + $0x8] sm:$0xff]  ;;  %vm798_vm4 = vcmask 1043456   ;;  %vm795_vm5 = vcmask 64512  }
  0x12   : > { %v1452_v6 = vsel %vm627_vm1, %v628_v5, 0  ;;  %s599_s26 = scalar_lea.vmem %s1596_s3, %s1256_s23  ;;  %v1282_v18 = vld [vmem:[%s1577_s6] ss:$0 sm:$0xff]  ;;  %vm734_vm14 = vcmask 130048   ;;  %v1264_v55 = vld [vmem:[%s1578_s7 + $0x8] sm:$0xff] }
  0x13   : > { %v631_v7 = vand.u32 %v1194_v3, %v1452_v6  ;;  %v1258_v8 = vld [vmem:[%s599_s26] sm:$0xff]  ;;  %782 = vmatpush.bf16.msra.mxu3 %v1264_v55 }
  0x14   : > { %v790_v27 = vld [vmem:[%s1580_s9] sm:$0xf] }
  0x15   : > { %640 = vmatpush.bf16.msra.mxu0 %v631_v7  ;;  %679 = vmatpush.bf16.msra.mxu1 %v1260_v10  ;;  %v800_v28 = vsel %vm798_vm4, %v790_v27, 0  ;;  %v1262_v54 = vld [vmem:[%s1598_s28] sm:$0xff] }
  0x16   : > { %v1263_v56 = vld [vmem:[%s1578_s7] sm:$0xff] }
  0x17   : > { %783 = vmatpush.bf16.msra.mxu3 %v1263_v56  ;;  %v1283_v61 = vld [vmem:[%s1581_s10] ss:$0 sm:$0xff]  ;;  %v1265_v7 = vld [vmem:[%s1582_s11] sm:$0x30] }
  0x18   : > { %1195 = vmatmul.msk.bf16.vlgmr.msra.gmra.mxu0 %vm622_vm2, %v1258_v8  ;;  %v1226_v5 = vld [vmem:[%s1582_s11] sm:$0xf] }
  0x19   : > { %809 = vmatpush.bf16.msrb.mxu0 %v800_v28 }
  0x28   : > { %1221 = vmatmul.msk.bf16.vlgmr.msrb.gmra.mxu0 %vm795_vm5, %v1258_v8  ;;  %v1227_v8 = vor.u32 %v1265_v7, %v1226_v5 }
  0x95   : > { %v642_v11 = vpop.f32.mrf.mxu0 }
  0x96   : > { %v1474_v15 = vadd.f32 %v642_v11, %v610_v12  ;;  %v872_v11 = vand.u32 %v1227_v8, %v1452_v6  ;;  %v1284_v6 = vld [vmem:[%s1579_s8] ss:$0 sm:$0xff] }
  0x9d   : > { %v644_v14 = vpop.f32.mrf.mxu0 }
  0x9e   : > { %v1476_v16 = vadd.f32 %v644_v14, %v611_v13 }
  0xa0   : > { %v651_v17 = vpack.c.bf16 %v1476_v16, %v1474_v15 }
  0xa2   : > { %1204 = vmatmul.msk.bf16.vlgmr.msra.gmra.mxu1 %vm668_vm3, %v651_v17 }
  0xa5   : > { %v811_v60 = vpop.f32.mrf.mxu0 }
  0xa6   : > { %v812_v63 = vadd.f32 %v1283_v61, %v811_v60 }
  0xa8   : > { %v1222_v1 = vmul.f32 -1.442695, %v812_v63 }
  0xad   : > { %v813_v62 = vpop.f32.mrf.mxu0 }
  0xae   : > { %v814_v0 = vadd.f32 %v1283_v61, %v813_v62 }
  0xb0   : > { %v1223_v2 = vmul.f32 -1.442695, %v814_v0 }
 0x11f   : > { %v681_v19 = vpop.f32.mrf.mxu1 }
 0x120   : > { %v682_v20 = vadd.f32 %v1282_v18, %v681_v19 }
 0x122   : > { %v1205_v21 = vmul.f32 -1.442695, %v682_v20 }
 0x124   : > { %1290 = vpow2.f32 %v1205_v21 }
 0x127   : > { %v683_v22 = vpop.f32.mrf.mxu1 }
 0x128   : > { %v684_v23 = vadd.f32 %v1282_v18, %v683_v22 }
 0x12a   : > { %v1291_v24 = vpop.eup %1290  ;;  %v1206_v25 = vmul.f32 -1.442695, %v684_v23 }
 0x12b   : > { %v692_v26 = vadd.f32 1.0, %v1291_v24 }
 0x12c   : > { %1292 = vpow2.f32 %v1206_v25 }
 0x12d   : > { %1294 = vrcp.f32 %v692_v26  ;;  %v705_v38 = vand.u32 2147483648, %v692_v26  ;;  %vm699_vm7 = vweird.f32 %v692_v26  ;;  %v703_v39 = vand.u32 2147483647, %v692_v26 }
 0x12f   : > { %v706_v45 = vor.u32 1.1754944e-38, %v705_v38  ;;  %vm704_vm10 = vcmp.eq.f32.partialorder %v703_v39, 8.507059e+37 }
 0x132   : > { %v1293_v29 = vpop.eup %1292 }
 0x133   : > { %v1295_v30 = vpop.eup %1294  ;;  %v693_v31 = vadd.f32 1.0, %v1293_v29 }
 0x134   : > { %v695_v32 = vmul.f32 %v1295_v30, %v692_v26  ;;  %vm700_vm6 = vweird.f32 %v1295_v30 }
 0x135   : > { %1296 = vrcp.f32 %v693_v31  ;;  %vm701_vm8 = vmor %vm699_vm7, %vm700_vm6  ;;  %v720_v41 = vand.u32 2147483648, %v693_v31  ;;  %v718_v44 = vand.u32 2147483647, %v693_v31  ;;  %vm714_vm11 = vweird.f32 %v693_v31 }
 0x136   : > { %v696_v33 = vsub.f32 1.0, %v695_v32  ;;  %1298 = vpow2.f32 %v1222_v1 }
 0x137   : > { %v721_v48 = vor.u32 1.1754944e-38, %v720_v41  ;;  %vm719_vm13 = vcmp.eq.f32.partialorder %v718_v44, 8.507059e+37  ;;  %1300 = vpow2.f32 %v1223_v2  ;;  %v1285_v41 = vld [vmem:[%s1583_s12] ss:$0 sm:$0xff] }
 0x138   : > { %v697_v34 = vmul.f32 %v1295_v30, %v696_v33 }
 0x13a   : > { %v698_v36 = vadd.f32 %v1295_v30, %v697_v34 }
 0x13b   : > { %v1297_v35 = vpop.eup %1296 }
 0x13c   : > { %v710_v37 = vmul.f32 %v1297_v35, %v693_v31  ;;  %v702_v42 = vsel %vm701_vm8, %v1295_v30, %v698_v36  ;;  %vm715_vm9 = vweird.f32 %v1297_v35  ;;  %v1299_v3 = vpop.eup %1298 }
 0x13d   : > { %v707_v47 = vsel %vm704_vm10, %v706_v45, %v702_v42  ;;  %vm716_vm12 = vmor %vm714_vm11, %vm715_vm9  ;;  %v1301_v4 = vpop.eup %1300  ;;  %v822_v9 = vadd.f32 1.0, %v1299_v3 }
 0x13e   : > { %v711_v40 = vsub.f32 1.0, %v710_v37  ;;  %v1488_v51 = vmul.f32 %v707_v47, %v1474_v15  ;;  %v823_v10 = vadd.f32 1.0, %v1301_v4 }
 0x13f   : > { %1302 = vrcp.f32 %v822_v9  ;;  %vm829_vm15 = vweird.f32 %v822_v9  ;;  %v835_v24 = vand.u32 2147483648, %v822_v9  ;;  %v833_v26 = vand.u32 2147483647, %v822_v9 }
 0x140   : > { %v712_v43 = vmul.f32 %v1297_v35, %v711_v40  ;;  %1304 = vrcp.f32 %v823_v10  ;;  %vm844_vm1 = vweird.f32 %v823_v10  ;;  %v850_v25 = vand.u32 2147483648, %v823_v10 }
 0x141   : > { %v848_v28 = vand.u32 2147483647, %v823_v10  ;;  %v836_v30 = vor.u32 1.1754944e-38, %v835_v24  ;;  %vm834_vm7 = vcmp.eq.f32.partialorder %v833_v26, 8.507059e+37 }
 0x142   : > { %v713_v46 = vadd.f32 %v1297_v35, %v712_v43  ;;  %v851_v31 = vor.u32 1.1754944e-38, %v850_v25 }
 0x143   : > { %vm849_vm8 = vcmp.eq.f32.partialorder %v848_v28, 8.507059e+37 }
 0x144   : > { %v717_v49 = vsel %vm716_vm12, %v1297_v35, %v713_v46 }
 0x145   : > { %v722_v50 = vsel %vm719_vm13, %v721_v48, %v717_v49  ;;  %v1303_v12 = vpop.eup %1302 }
 0x146   : > { %v1491_v52 = vmul.f32 %v722_v50, %v1476_v16  ;;  %v1305_v13 = vpop.eup %1304  ;;  %v825_v14 = vmul.f32 %v1303_v12, %v822_v9  ;;  %vm830_vm0 = vweird.f32 %v1303_v12 }
 0x147   : > { %v840_v17 = vmul.f32 %v1305_v13, %v823_v10  ;;  %vm845_vm4 = vweird.f32 %v1305_v13  ;;  %vm831_vm5 = vmor %vm829_vm15, %vm830_vm0 }
 0x148   : > { %v728_v53 = vpack.c.bf16 %v1491_v52, %v1488_v51  ;;  %v826_v18 = vsub.f32 1.0, %v825_v14  ;;  %vm846_vm6 = vmor %vm844_vm1, %vm845_vm4 }
 0x149   : > { %v841_v19 = vsub.f32 1.0, %v840_v17 }
 0x14a   : > { %745 = vmatpush.bf16.msra.mxu2 %v728_v53  ;;  %v827_v20 = vmul.f32 %v1303_v12, %v826_v18 }
 0x14b   : > { %v842_v21 = vmul.f32 %v1305_v13, %v841_v19 }
 0x14c   : > { %v828_v23 = vadd.f32 %v1303_v12, %v827_v20 }
 0x14d   : > { %1211 = vmatmul.msk.bf16.vlgmr.msra.gmra.mxu2 %vm734_vm14, %v1262_v54  ;;  %v843_v27 = vadd.f32 %v1305_v13, %v842_v21  ;;  %v1334_v54 = vmov 32.0  }
 0x14e   : > { %881 = vmatpush.bf16.msrb.mxu2 %v872_v11  ;;  %v832_v29 = vsel %vm831_vm5, %v1303_v12, %v828_v23  ;;  %1306 = vrcp.f32 %v1334_v54 }
 0x14f   : > { %v847_v33 = vsel %vm846_vm6, %v1305_v13, %v843_v27  ;;  %v837_v36 = vsel %vm834_vm7, %v836_v30, %v832_v29  ;;  %v1286_v27 = vld [vmem:[%s1584_s13] ss:$0 sm:$0xff] }
 0x150   : > { %v852_v37 = vsel %vm849_vm8, %v851_v31, %v847_v33  ;;  %v1287_v31 = vld [vmem:[%s1585_s14] ss:$0 sm:$0xff] }
 0x154   : > { %v1307_v55 = vpop.eup %1306 }
 0x155   : > { %v899_v56 = vmul.f32 32.0, %v1307_v55 }
 0x1d0   : > { %v747_v57 = vpop.f32.mrf.mxu2 }
 0x1d8   : > { %v749_v58 = vpop.f32.mrf.mxu2 }
 0x1d9   : > { %v756_v59 = vpack.c.bf16 %v749_v58, %v747_v57  ;;  %v900_v57 = vsub.f32 1.0, %v899_v56 }
 0x1db   : > { %1220 = vmatmul.msk.bf16.vlgmr.msra.gmra.mxu3 %vm668_vm3, %v756_v59  ;;  %v901_v58 = vmul.f32 %v1307_v55, %v900_v57 }
 0x1dd   : > { %v902_v59 = vadd.f32 %v1307_v55, %v901_v58 }
 0x25e   : > { %v785_v22 = vpop.f32.mrf.mxu3 }
 0x25f   : > { %v786_v32 = vadd.f32 %v1284_v6, %v785_v22 }
 0x261   : > { %v854_v38 = vmul.f32 %v837_v36, %v786_v32  ;;  %v955_v36 = vsub.f32 %v1474_v15, %v1488_v51 }
 0x266   : > { %v787_v34 = vpop.f32.mrf.mxu3 }
 0x267   : > { %v788_v35 = vadd.f32 %v1284_v6, %v787_v34 }
 0x269   : > { %v855_v39 = vmul.f32 %v852_v37, %v788_v35  ;;  %v956_v37 = vsub.f32 %v1476_v16, %v1491_v52 }
 0x26b   : > { %v858_v40 = vpack.c.bf16 %v855_v39, %v854_v38 }
 0x26d   : > { %1228 = vmatmul.msk.bf16.vlgmr.msrb.gmra.mxu2 %vm622_vm2, %v858_v40  ;;  %vm903_vm2 = vweird.f32 %v1307_v55 }
 0x26e   : > { %v904_v60 = vsel %vm903_vm2, %v1307_v55, %v902_v59  ;;  %vm1120_vm2 = vcmask 7168  }
 0x2f0   : > { %v883_v42 = vpop.f32.mrf.mxu2 }
 0x2f1   : > { %v884_v43 = vadd.f32 %v1285_v41, %v883_v42  ;;  %v1266_v42 = vld [vmem:[%s1599_s25] sm:$0xff] }
 0x2f3   : > { %v888_v44 = vmax.f32 %v884_v43, 0.0 }
 0x2f5   : > { %v890_v45 = vsub.f32 %v1474_v15, %v888_v44  ;;  %v1267_v15 = vld [vmem:[%s1586_s15] sm:$0xff] }
 0x2f6   : > { %v1288_v44 = vld [vmem:[%s1587_s16] ss:$0 sm:$0xff] }
 0x2f7   : > { %v892_v46 = vsel %vm668_vm3, %v890_v45, 0.0 }
 0x2f8   : > { %v885_v47 = vpop.f32.mrf.mxu2  ;;  %893 = vadd.xlane.f32.xlu0 %v892_v46 }
 0x2f9   : > { %v886_v48 = vadd.f32 %v1285_v41, %v885_v47 }
 0x2fb   : > { %v889_v49 = vmax.f32 %v886_v48, 0.0 }
 0x2fd   : > { %v891_v50 = vsub.f32 %v1476_v16, %v889_v49 }
 0x2ff   : > { %v895_v53 = vsel %vm668_vm3, %v891_v50, 0.0 }
 0x300   : > { %896 = vadd.xlane.f32.xlu0 %v895_v53 }
 0x314   : > { %1112 = vrot.lane.b32.xlu0 %v884_v43, %s1333_s0  ;;  %v1268_v43 = vld [vmem:[%s1586_s15 + $0x8] sm:$0xff] }
 0x315   : > { %1014 = vmatpush.bf16.msrb.mxu3 %v1268_v43 }
 0x319   : > { %1015 = vmatpush.bf16.msrb.mxu3 %v1267_v15 }
 0x36b   : > { %v894_v61 = vpop.xlane.xlu0 %893 }
 0x36c   : > { %v905_v62 = vmul.f32 %v904_v60, %v894_v61 }
 0x36e   : > { %v907_v63 = vsub.f32 %v890_v45, %v905_v62 }
 0x370   : > { %v909_v0 = vmul.f32 %v907_v63, %v907_v63 }
 0x372   : > { %v911_v1 = vsel %vm668_vm3, %v909_v0, 0.0 }
 0x373   : > { %912 = vadd.xlane.f32.xlu1 %v911_v1  ;;  %v897_v2 = vpop.xlane.xlu0 %896 }
 0x374   : > { %v906_v3 = vmul.f32 %v904_v60, %v897_v2 }
 0x376   : > { %v908_v4 = vsub.f32 %v891_v50, %v906_v3 }
 0x378   : > { %v910_v5 = vmul.f32 %v908_v4, %v908_v4 }
 0x37a   : > { %v914_v7 = vsel %vm668_vm3, %v910_v5, 0.0 }
 0x37b   : > { %915 = vadd.xlane.f32.xlu1 %v914_v7 }
 0x394   : > { %1114 = vrot.lane.b32.xlu1 %v886_v48, %s1333_s0 }
 0x3e6   : > { %v913_v8 = vpop.xlane.xlu1 %912 }
 0x3e7   : > { %v917_v9 = vmul.f32 %v913_v8, %v904_v60 }
 0x3e9   : > { %v919_v10 = vadd.f32 1e-05, %v917_v9 }
 0x3eb   : > { %1308 = vrsqrt.f32 %v919_v10  ;;  %vm927_vm10 = vweird.f32 %v919_v10 }
 0x3ee   : > { %v916_v11 = vpop.xlane.xlu1 %915 }
 0x3ef   : > { %v918_v12 = vmul.f32 %v916_v11, %v904_v60 }
 0x3f1   : > { %v1309_v13 = vpop.eup %1308  ;;  %v920_v14 = vadd.f32 1e-05, %v918_v12 }
 0x3f2   : > { %v922_v17 = vmul.f32 %v1309_v13, %v919_v10  ;;  %vm928_vm9 = vweird.f32 %v1309_v13 }
 0x3f3   : > { %1310 = vrsqrt.f32 %v920_v14  ;;  %vm929_vm11 = vmor %vm927_vm10, %vm928_vm9  ;;  %vm937_vm13 = vweird.f32 %v920_v14 }
 0x3f4   : > { %v923_v18 = vmul.f32 %v1309_v13, %v922_v17  ;;  %v1269_v17 = vld [vmem:[%s1588_s17] sm:$0xff] }
 0x3f6   : > { %v924_v19 = vmul.f32 0.5, %v923_v18 }
 0x3f8   : > { %v925_v20 = vsub.f32 1.5, %v924_v19 }
 0x3f9   : > { %v1311_v21 = vpop.eup %1310 }
 0x3fa   : > { %v926_v22 = vmul.f32 %v1309_v13, %v925_v20  ;;  %v932_v23 = vmul.f32 %v1311_v21, %v920_v14  ;;  %vm938_vm12 = vweird.f32 %v1311_v21  ;;  %v1270_v14 = vld [vmem:[%s1588_s17 + $0x8] sm:$0xff] }
 0x3fb   : > { %vm939_vm15 = vmor %vm937_vm13, %vm938_vm12  ;;  %1102 = vmatpush.bf16.msra.mxu0 %v1270_v14 }
 0x3fc   : > { %v930_v24 = vsel %vm929_vm11, %v1309_v13, %v926_v22  ;;  %v933_v25 = vmul.f32 %v1311_v21, %v932_v23 }
 0x3fd   : > { %v941_v26 = vmul.f32 %v930_v24, %v907_v63 }
 0x3fe   : > { %v934_v6 = vmul.f32 0.5, %v933_v25  ;;  %v1289_v25 = vld [vmem:[#allocation2] ss:$0 sm:$0xff] }
 0x3ff   : > { %v947_v30 = vmul.f32 %v1286_v27, %v941_v26  ;;  %1103 = vmatpush.bf16.msra.mxu0 %v1269_v17 }
 0x400   : > { %v935_v28 = vsub.f32 1.5, %v934_v6 }
 0x401   : > { %v953_v35 = vadd.f32 %v1287_v31, %v947_v30 }
 0x402   : > { %v936_v29 = vmul.f32 %v1311_v21, %v935_v28 }
 0x403   : > { %v957_v39 = vadd.f32 %v955_v36, %v953_v35 }
 0x404   : > { %v940_v32 = vsel %vm939_vm15, %v1311_v21, %v936_v29 }
 0x405   : > { %v942_v33 = vmul.f32 %v940_v32, %v908_v4 }
 0x407   : > { %v948_v34 = vmul.f32 %v1286_v27, %v942_v33  ;;  %v1113_v27 = vpop.permute.xlu0 %1112 }
 0x409   : > { %v954_v38 = vadd.f32 %v1287_v31, %v948_v34  ;;  %v1115_v31 = vpop.permute.xlu1 %1114 }
 0x40b   : > { %v958_v40 = vadd.f32 %v956_v37, %v954_v38 }
 0x40d   : > { %v961_v41 = vpack.c.bf16 %v958_v40, %v957_v39 }
 0x40f   : > { %977 = vmatpush.bf16.msrb.mxu1 %v961_v41 }
 0x412   : > { %1233 = vmatmul.msk.bf16.vlgmr.msrb.gmra.mxu1 %vm734_vm14, %v1266_v42 }
 0x48f   : > { %v979_v16 = vpop.f32.mrf.mxu1 }
 0x497   : > { %v981_v51 = vpop.f32.mrf.mxu1 }
 0x498   : > { %v988_v52 = vpack.c.bf16 %v981_v51, %v979_v16 }
 0x49a   : > { %1242 = vmatmul.msk.bf16.vlgmr.msrb.gmra.mxu3 %vm668_vm3, %v988_v52 }
 0x51d   : > { %v1017_v45 = vpop.f32.mrf.mxu3 }
 0x51e   : > { %v1018_v46 = vadd.f32 %v1288_v44, %v1017_v45 }
 0x520   : > { %v1243_v47 = vmul.f32 -1.442695, %v1018_v46 }
 0x522   : > { %1312 = vpow2.f32 %v1243_v47 }
 0x525   : > { %v1019_v48 = vpop.f32.mrf.mxu3 }
 0x526   : > { %v1020_v49 = vadd.f32 %v1288_v44, %v1019_v48 }
 0x528   : > { %v1313_v50 = vpop.eup %1312  ;;  %v1244_v53 = vmul.f32 -1.442695, %v1020_v49 }
 0x529   : > { %v1030_v54 = vadd.f32 1.0, %v1313_v50 }
 0x52a   : > { %1314 = vpow2.f32 %v1244_v53 }
 0x52b   : > { %1316 = vrcp.f32 %v1030_v54  ;;  %v1043_v60 = vand.u32 2147483648, %v1030_v54  ;;  %v1041_v62 = vand.u32 2147483647, %v1030_v54  ;;  %vm1037_vm0 = vweird.f32 %v1030_v54 }
 0x52d   : > { %v1044_v1 = vor.u32 1.1754944e-38, %v1043_v60  ;;  %vm1042_vm4 = vcmp.eq.f32.partialorder %v1041_v62, 8.507059e+37 }
 0x530   : > { %v1315_v55 = vpop.eup %1314 }
 0x531   : > { %v1317_v56 = vpop.eup %1316  ;;  %v1031_v57 = vadd.f32 1.0, %v1315_v55 }
 0x532   : > { %v1033_v58 = vmul.f32 %v1317_v56, %v1030_v54  ;;  %vm1038_vm14 = vweird.f32 %v1317_v56 }
 0x533   : > { %1318 = vrcp.f32 %v1031_v57  ;;  %vm1039_vm1 = vmor %vm1037_vm0, %vm1038_vm14  ;;  %v1058_v7 = vand.u32 2147483648, %v1031_v57  ;;  %v1056_v9 = vand.u32 2147483647, %v1031_v57  ;;  %vm1052_vm6 = vweird.f32 %v1031_v57 }
 0x534   : > { %v1034_v59 = vsub.f32 1.0, %v1033_v58  ;;  %1320 = vtanh.f32 %v1018_v46 }
 0x535   : > { %v1059_v11 = vor.u32 1.1754944e-38, %v1058_v7  ;;  %vm1057_vm8 = vcmp.eq.f32.partialorder %v1056_v9, 8.507059e+37  ;;  %1322 = vtanh.f32 %v1020_v49 }
 0x536   : > { %v1035_v61 = vmul.f32 %v1317_v56, %v1034_v59 }
 0x538   : > { %v1036_v63 = vadd.f32 %v1317_v56, %v1035_v61 }
 0x539   : > { %v1319_v0 = vpop.eup %1318 }
 0x53a   : > { %v1040_v2 = vsel %vm1039_vm1, %v1317_v56, %v1036_v63  ;;  %v1048_v3 = vmul.f32 %v1319_v0, %v1031_v57  ;;  %vm1053_vm5 = vweird.f32 %v1319_v0  ;;  %v1321_v19 = vpop.eup %1320 }
 0x53b   : > { %v1045_v4 = vsel %vm1042_vm4, %v1044_v1, %v1040_v2  ;;  %vm1054_vm7 = vmor %vm1052_vm6, %vm1053_vm5  ;;  %v1323_v20 = vpop.eup %1322 }
 0x53c   : > { %1064 = vrot.lane.b32.xlu2 %v1045_v4, %s1333_s0  ;;  %v1049_v5 = vsub.f32 1.0, %v1048_v3 }
 0x53e   : > { %v1050_v8 = vmul.f32 %v1319_v0, %v1049_v5 }
 0x540   : > { %v1051_v10 = vadd.f32 %v1319_v0, %v1050_v8 }
 0x542   : > { %v1055_v12 = vsel %vm1054_vm7, %v1319_v0, %v1051_v10 }
 0x543   : > { %v1060_v13 = vsel %vm1057_vm8, %v1059_v11, %v1055_v12 }
 0x544   : > { %1066 = vrot.lane.b32.xlu2 %v1060_v13, %s1333_s0  ;;  %s1257_s0 = sshll.u32 %s1601_s21, 4 }
 0x545   : > { %s604_s3 = scalar_lea.vmem %s1590_s19, %s1257_s0 }
 0x596   : > { %v1065_v18 = vpop.permute.xlu2 %1064 }
 0x597   : > { %v1070_v22 = vmul.f32 %v1321_v19, %v1065_v18 }
 0x59e   : > { %v1067_v21 = vpop.permute.xlu2 %1066 }
 0x59f   : > { %v1071_v23 = vmul.f32 %v1323_v20, %v1067_v21 }
 0x5a1   : > { %v1076_v24 = vpack.c.bf16 %v1071_v23, %v1070_v22 }
 0x5a3   : > { %1253 = vmatmul.msk.bf16.vlgmr.msra.gmra.mxu0 %vm668_vm3, %v1076_v24 }
 0x620   : > { %v1105_v6 = vpop.f32.mrf.mxu0 }
 0x621   : > { %v1106_v26 = vadd.f32 %v1289_v25, %v1105_v6 }
 0x623   : > { %v1118_v28 = vadd.f32 %v1113_v27, %v1106_v26 }
 0x625   : > { %1121 = vst.msk [vmem:[%s604_s3] sm:$0xff] %vm1120_vm2, %v1118_v28 }
 0x628   : > { %v1107_v29 = vpop.f32.mrf.mxu0 }
 0x629   : > { %v1108_v30 = vadd.f32 %v1289_v25, %v1107_v29 }
 0x62b   : > { %v1119_v32 = vadd.f32 %v1115_v31, %v1108_v30 }
 0x62d   : > { %1122 = vst.msk [vmem:[%s604_s3 + $0x8] sm:$0xff] %vm1120_vm2, %v1119_v32 }
 0x62e PF: > { %s31_s20 = sadd.s32 1, %s1330_s20  }
 0x62f   : > { %p28_p4 = scmp.ge.s32.totalorder %s31_s20, 4  }
 0x631   :  { %30 = sbr.rel (!%p28_p4) target bundleno = 5 (0x5), region = 126 }

</bundles_post_ra>
